<compile_context>
chip_gen: v7x
topology: tpu7x:2x2x1
jax: 0.10.0
libtpu: 0.0.40
codegen_flags: <defaults>
</compile_context>

<pallas_src>
import jax
import jax.numpy as jnp
from jax.experimental import pallas as pl
from jax.experimental.pallas import tpu as pltpu


def _make_kernel(compute_dtype):
    def kernel(ah_ref, a_ref, y_ref, x_ref, err_ref):
        # y tile : (M, tb) — M on sublanes, tb (multiple of 128, or all of B)
        # on lanes.  Kept in f32 for the final subtraction.
        y = y_ref[...]

        # x = AH @ y  -> (N, tb); lane-dense result, unmasked stores.
        x = jnp.dot(
            ah_ref[...].astype(compute_dtype),
            y.astype(compute_dtype),
            preferred_element_type=jnp.float32,
        )
        x_ref[...] = x.astype(x_ref.dtype)

        # recon = A @ x -> (M, tb);  err = y - recon (subtraction in f32).
        recon = jnp.dot(
            a_ref[...].astype(compute_dtype),
            x.astype(compute_dtype),
            preferred_element_type=jnp.float32,
        )
        err_ref[...] = (y - recon).astype(err_ref.dtype)

    return kernel


def _pick_col_tile(B, col_tile):
    """Lane-axis tile: a multiple of 128 (or all of B when B <= 128), chosen
    so the grid has >= 2 steps whenever B allows it (enables double-buffering
    and core-level parallelism)."""
    if B <= 128:
        return B
    cap = max(128, (col_tile // 128) * 128)
    half = max(128, (B // 2 // 128) * 128)  # aim for >= 2 grid steps
    return min(cap, half)


def aorih_forward(A, AH, y, *, col_tile=1024, compute_dtype=jnp.float32):
    """Pallas implementation of AoriH.forward(y) -> (x, err).

    A : (M, N), AH : (N, M), y : (M, B)  ->  x : (N, B), err : (M, B)
    """
    M, N = A.shape
    assert AH.shape == (N, M)
    assert y.shape[0] == M
    B = y.shape[1]

    tb = _pick_col_tile(B, col_tile)
    grid = (pl.cdiv(B, tb),)

    x, err = pl.pallas_call(
        _make_kernel(compute_dtype),
        out_shape=(
            jax.ShapeDtypeStruct((N, B), y.dtype),   # x
            jax.ShapeDtypeStruct((M, B), y.dtype),   # err
        ),
        grid=grid,
        in_specs=[
            pl.BlockSpec((N, M), lambda b: (0, 0)),   # AH, resident in VMEM
            pl.BlockSpec((M, N), lambda b: (0, 0)),   # A,  resident in VMEM
            pl.BlockSpec((M, tb), lambda b: (0, b)),  # y column tile, pipelined
        ],
        out_specs=(
            pl.BlockSpec((N, tb), lambda b: (0, b)),  # x column tile
            pl.BlockSpec((M, tb), lambda b: (0, b)),  # err column tile
        ),
        compiler_params=pltpu.CompilerParams(
            dimension_semantics=("parallel",),
        ),
    )(AH, A, y)

    return x, err


if __name__ == "__main__":
    key = jax.random.PRNGKey(0)
    kA, kY1, kY2, kY3 = jax.random.split(key, 4)

    # Small deterministic problem: M measurements, N-dim signal.
    M, N = 64, 128
    A = jax.random.normal(kA, (M, N), dtype=jnp.float32) / jnp.sqrt(jnp.float32(M))
    AH = A.T  # real-valued Hermitian transpose, matching the AoriH construction

    # (B, col_tile): ragged multi-step grid, exactly-dividing multi-step grid,
    # and the tiny single-tile path.
    cases = [(200, 1024, kY1), (512, 256, kY2), (16, 1024, kY3)]
    for B, tile, kY in cases:
        y = jax.random.normal(kY, (M, B), dtype=jnp.float32)

        x, err = aorih_forward(A, AH, y, col_tile=tile)
        jax.block_until_ready((x, err))

        # Plain-JAX reference.
        x_ref = AH @ y
        err_ref = y - A @ x_ref

        assert x.shape == (N, B) and err.shape == (M, B)
        assert jnp.allclose(x, x_ref, atol=1e-4, rtol=1e-4)
        assert jnp.allclose(err, err_ref, atol=1e-4, rtol=1e-4)

    # Optional bf16-operand MXU fast path (v6e/v7x); looser tolerance vs the
    # f32 reference because operands are rounded to bf16 before the dots.
    y = jax.random.normal(kY1, (M, 512), dtype=jnp.float32)
    x_bf, err_bf = aorih_forward(A, AH, y, compute_dtype=jnp.bfloat16)
    jax.block_until_ready((x_bf, err_bf))
    x_ref = AH @ y
    err_ref = y - A @ x_ref
    assert jnp.allclose(x_bf, x_ref, atol=0.15, rtol=0.05)
    assert jnp.allclose(err_bf, err_ref, atol=0.15, rtol=0.05)

    print("KERNEL_OK")
</pallas_src>

<mosaic_0001>
module attributes {stable_mosaic.version = 11 : i64} {
  func.func @kernel(%arg0: i32, %arg1: memref<128x64xf32, #tpu.memory_space<vmem>>, %arg2: memref<64x128xf32, #tpu.memory_space<vmem>>, %arg3: memref<64x128xf32, #tpu.memory_space<vmem>>, %arg4: memref<128x128xf32, #tpu.memory_space<vmem>>, %arg5: memref<64x128xf32, #tpu.memory_space<vmem>>) attributes {dimension_semantics = [#tpu.dimension_semantics<parallel>], iteration_bounds = array<i64: 2>, scalar_prefetch = 0 : i64, scratch_operands = 0 : i64, tpu.core_type = #tpu.core_type<tc>, window_params = [{pipeline_mode = #tpu.pipeline_mode<synchronous>, transform_indices = @transform_0, window_bounds = array<i64: 128, 64>}, {pipeline_mode = #tpu.pipeline_mode<synchronous>, transform_indices = @transform_1, window_bounds = array<i64: 64, 128>}, {transform_indices = @transform_2, window_bounds = array<i64: 64, 128>}, {transform_indices = @transform_3, window_bounds = array<i64: 128, 128>}, {transform_indices = @transform_4, window_bounds = array<i64: 64, 128>}]} {
    %c0 = arith.constant 0 : index
    %c0_0 = arith.constant 0 : index
    %0 = vector.load %arg3[%c0, %c0_0] : memref<64x128xf32, #tpu.memory_space<vmem>>, vector<64x128xf32>
    %c0_1 = arith.constant 0 : index
    %c0_2 = arith.constant 0 : index
    %1 = vector.load %arg1[%c0_1, %c0_2] : memref<128x64xf32, #tpu.memory_space<vmem>>, vector<128x64xf32>
    %cst = arith.constant dense<0.000000e+00> : vector<128x128xf32>
    %2 = tpu.matmul %1, %0, %cst {dimension_numbers = #tpu.dot_dimension_numbers<[1], [0], [0], [1], [0, 0, 1, 1], [], []>} : vector<128x64xf32>, vector<64x128xf32>, vector<128x128xf32> -> vector<128x128xf32>
    %c0_3 = arith.constant 0 : index
    %c0_4 = arith.constant 0 : index
    %3 = vector.load %arg4[%c0_3, %c0_4] : memref<128x128xf32, #tpu.memory_space<vmem>>, vector<128x128xf32>
    tpu.vector_store %arg4[%c0_3, %c0_4], %2 {strides = array<i32>} : memref<128x128xf32, #tpu.memory_space<vmem>>, vector<128x128xf32>,
    %c0_5 = arith.constant 0 : index
    %c0_6 = arith.constant 0 : index
    %4 = vector.load %arg2[%c0_5, %c0_6] : memref<64x128xf32, #tpu.memory_space<vmem>>, vector<64x128xf32>
    %cst_7 = arith.constant dense<0.000000e+00> : vector<64x128xf32>
    %5 = tpu.matmul %4, %2, %cst_7 {dimension_numbers = #tpu.dot_dimension_numbers<[1], [0], [0], [1], [0, 0, 1, 1], [], []>} : vector<64x128xf32>, vector<128x128xf32>, vector<64x128xf32> -> vector<64x128xf32>
    %6 = arith.subf %0, %5 : vector<64x128xf32>
    %c0_8 = arith.constant 0 : index
    %c0_9 = arith.constant 0 : index
    %7 = vector.load %arg5[%c0_8, %c0_9] : memref<64x128xf32, #tpu.memory_space<vmem>>, vector<64x128xf32>
    tpu.vector_store %arg5[%c0_8, %c0_9], %6 {strides = array<i32>} : memref<64x128xf32, #tpu.memory_space<vmem>>, vector<64x128xf32>,
    return
  }
  func.func @transform_0(%arg0: i32) -> (i32, i32) {
    %c0_i32 = arith.constant 0 : i32
    %c0_i32_0 = arith.constant 0 : i32
    %c0_i32_1 = arith.constant 0 : i32
    return %c0_i32, %c0_i32_0 : i32, i32
  }
  func.func @transform_1(%arg0: i32) -> (i32, i32) {
    %c0_i32 = arith.constant 0 : i32
    %c0_i32_0 = arith.constant 0 : i32
    %c0_i32_1 = arith.constant 0 : i32
    return %c0_i32, %c0_i32_0 : i32, i32
  }
  func.func @transform_2(%arg0: i32) -> (i32, i32) {
    %c0_i32 = arith.constant 0 : i32
    %c0_i32_0 = arith.constant 0 : i32
    return %c0_i32, %arg0 : i32, i32
  }
  func.func @transform_3(%arg0: i32) -> (i32, i32) {
    %c0_i32 = arith.constant 0 : i32
    %c0_i32_0 = arith.constant 0 : i32
    return %c0_i32, %arg0 : i32, i32
  }
  func.func @transform_4(%arg0: i32) -> (i32, i32) {
    %c0_i32 = arith.constant 0 : i32
    %c0_i32_0 = arith.constant 0 : i32
    return %c0_i32, %arg0 : i32, i32
  }
}

</mosaic_0001>

<bundles_post_ra>
// kernel: tpu_custom_call.1
= control target key start
LH: loop header
LB: loop body
LE: loop exit
PB: predicated region body
PF: predicated region fallthrough
CT: control target
= control target key end

     0   :  { %10 = vsyncpa [#allocation5], 0  ;;  %s1471_s0 = inlined_call_operand.vmem [shape: f32[128,64], index: 0, kind: input, shape index: {}]   ;;  %s1472_s1 = inlined_call_operand.vmem [shape: f32[64,128], index: 1, kind: input, shape index: {}]   ;;  %s1473_s2 = inlined_call_operand.vmem [shape: f32[64,200], index: 2, kind: input, shape index: {}]   ;;  %s1474_s3 = inlined_call_operand.vmem [shape: f32[128,200], index: 3, kind: output, shape index: {0}]   ;;  %s1475_s4 = inlined_call_operand.hbm [shape: f32[64,200], index: 4, kind: output, shape index: {1}]  }
   0x1   :  { %12 = vsyncpa [#allocation5 + $0x1], 0  ;;  %s1184_s15 = smov 0   ;;  %s1186_s16 = smov 0  }
   0x2   :  { %s1188_s17 = smov 0   ;;  %s1190_s18 = smov 0  }
   0x3 LB: > { %s1205_s19 = sadd.s32 4294967295, %s1153_s18   ;;  %s838_s20 = sadd.s32 4294967294, %s1153_s18   ;;  %s1153_s18 = sphi %s1190_s18, %s1481_s18   ;;  %s1149_s17 = sphi %s1188_s17, %s1480_s17   ;;  %s1145_s16 = sphi %s1186_s16, %s1479_s16   ;;  %s1141_s15 = sphi %s1184_s15, %s1478_s15  }
   0x4   : > { %s1209_s21 = sadd.s32 1, %s1153_s18   ;;  %s67_s22 = sadd.s32 1, %s1149_s17 }
   0x5   : > { %s64_s23 = ssub.s32 %s1153_s18, %s1209_s21  ;;  %p74_p0 = scmp.ne.s32.totalorder %s1149_s17, %s1145_s16 }
   0x6   : > { %p65_p1 = scmp.eq.s32.totalorder %s64_s23, 0  ;;  %p75_p2 = scmp.eq.s32.totalorder %s1153_s18, 0 }
   0x7   : > { %p104_p3 = scmp.eq.s32.totalorder %s1205_s19, 1  ;;  %p135_p4 = scmp.ne.s32.totalorder %s1145_s16, %s1141_s15 }
   0x8   : > { %s1221_s24 = scalar_select %p65_p1, %s1149_s17, %s67_s22  }
   0x9   : > { %p76_p5 = por %p75_p2, %p74_p0  ;;  %p1223_p6 = por %p104_p3, %p74_p0 }
   0xa   : > { %p136_p7 = scmp.eq.s32.totalorder %s838_s20, 1  ;;  %p840_p9 = scmp.ge.s32.totalorder %s1153_s18, 2 }
   0xc   : > { %p1227_p8 = por %p136_p7, %p135_p4  ;;  %158 = sbr.rel (%p840_p9) target bundleno = 27 (0x1b), region = 24 }
  0x13   : > { %161 = sbr.rel (!%p76_p5) target bundleno = 27 (0x1b), region = 28  ;;  %s163_s27 = sand.u32 (%p76_p5), 1, %s1149_s17  }
  0x14   : > { %s842_s28 = sshll.u32 (%p76_p5), %s1153_s18, 3  ;;  %s841_s29 = sshll.u32 (%p76_p5), %s163_s27, 6 }
  0x15   : > { %s167_s6 = scalar_lea.vmem (%p76_p5), %s1473_s2, %s842_s28  ;;  %s165_s7 = scalar_lea.vmem (%p76_p5), [#allocation2], %s841_s29 }
  0x16   : > { %v209_v0 = vld [vmem:[%s167_s6] sm:$0xff] (%p76_p5)  ;;  %v211_v1 = vld [vmem:[%s167_s6 + $0x10] sm:$0xff] (%p76_p5) }
  0x17   : > { %v213_v2 = vld [vmem:[%s167_s6 + $0x20] sm:$0xff] (%p76_p5)  ;;  %210 = vst [vmem:[%s165_s7] sm:$0xff] (%p76_p5), %v209_v0  ;;  %212 = vst [vmem:[%s165_s7 + $0x8] sm:$0xff] (%p76_p5), %v211_v1  ;;  %v215_v3 = vld [vmem:[%s167_s6 + $0x30] sm:$0xff] (%p76_p5) }
  0x18   : > { %214 = vst [vmem:[%s165_s7 + $0x10] sm:$0xff] (%p76_p5), %v213_v2  ;;  %v217_v4 = vld [vmem:[%s167_s6 + $0x40] sm:$0xff] (%p76_p5)  ;;  %v219_v5 = vld [vmem:[%s167_s6 + $0x50] sm:$0xff] (%p76_p5)  ;;  %216 = vst [vmem:[%s165_s7 + $0x18] sm:$0xff] (%p76_p5), %v215_v3 }
  0x19   : > { %218 = vst [vmem:[%s165_s7 + $0x20] sm:$0xff] (%p76_p5), %v217_v4  ;;  %220 = vst [vmem:[%s165_s7 + $0x28] sm:$0xff] (%p76_p5), %v219_v5  ;;  %v221_v6 = vld [vmem:[%s167_s6 + $0x60] sm:$0xff] (%p76_p5)  ;;  %v223_v7 = vld [vmem:[%s167_s6 + $0x70] sm:$0xff] (%p76_p5) }
  0x1a   : > { %222 = vst [vmem:[%s165_s7 + $0x30] sm:$0xff] %v221_v6  ;;  %224 = vst [vmem:[%s165_s7 + $0x38] sm:$0xff] %v223_v7 }
  0x1b PF: > { %p843_p10 = scmp.ge.s32.totalorder %s1153_s18, 1  ;;  %p229_p11 = scmp.lt.s32.totalorder %s1153_s18, 3 }
  0x1d   : > { %p230_p12 = pnand %p843_p10, %p229_p11 }
  0x1e   : > { %s1242_s8 = sand.u32 (!%p230_p12), 1, %s1145_s16   ;;  %v273_v8 = vld [vmem:[%s1471_s0] sm:$0xff] (!%p230_p12)  ;;  %vm289_vm0 = vcmask (!%p230_p12), 523264   ;;  %v274_v21 = vld [vmem:[%s1471_s0 + $0x8] sm:$0xff] (!%p230_p12)  ;;  %v275_v22 = vld [vmem:[%s1471_s0 + $0x10] sm:$0xff] (!%p230_p12) }
  0x1f   : > { %233 = sbr.rel (%p230_p12) target bundleno = 553 (0x229), region = 66  ;;  %s844_s11 = sshll.u32 (!%p230_p12), %s1242_s8, 6  ;;  %933 = vmatprep.mubr.msk.f32.mxu0 (!%p230_p12), %vm289_vm0, %v273_v8  ;;  %v276_v23 = vld [vmem:[%s1471_s0 + $0x18] sm:$0xff] (!%p230_p12)  ;;  %v277_v24 = vld [vmem:[%s1471_s0 + $0x20] sm:$0xff] (!%p230_p12)  ;;  %v278_v25 = vld [vmem:[%s1471_s0 + $0x28] sm:$0xff] (!%p230_p12) }
  0x20   : > { %s238_s12 = scalar_lea.vmem (!%p230_p12), [#allocation2], %s844_s11  ;;  %v279_v26 = vld [vmem:[%s1471_s0 + $0x30] sm:$0xff] (!%p230_p12)  ;;  %v280_v27 = vld [vmem:[%s1471_s0 + $0x38] sm:$0xff] (!%p230_p12)  ;;  %v281_v28 = vld [vmem:[%s1471_s0 + $0x40] sm:$0xff] (!%p230_p12)  ;;  %s845_s20 = sshll.u32 (!%p230_p12), %s1242_s8, 7 }
  0x21   : > { %v1251_v9 = vld [vmem:[%s238_s12] sm:$0xff] (!%p230_p12)  ;;  %v1253_v10 = vld [vmem:[%s238_s12 + $0x8] sm:$0xff] (!%p230_p12)  ;;  %v1255_v11 = vld [vmem:[%s238_s12 + $0x10] sm:$0xff] (!%p230_p12)  ;;  %s1339_s22 = scalar_lea.vmem (!%p230_p12), [#allocation3], %s845_s20  ;;  %s1382_s23 = scalar_lea.vmem (!%p230_p12), [#allocation4], %s844_s11 }
  0x22   : > { %v1001_v12 = vpack.c.bf16 (!%p230_p12), %v1253_v10, %v1251_v9  ;;  %v1259_v13 = vld [vmem:[%s238_s12 + $0x18] sm:$0xff] (!%p230_p12)  ;;  %v1263_v15 = vld [vmem:[%s238_s12 + $0x20] sm:$0xff] (!%p230_p12)  ;;  %v1265_v16 = vld [vmem:[%s238_s12 + $0x28] sm:$0xff] (!%p230_p12)  ;;  %s633_s11 = scalar_lea.sflag (!%p230_p12), [#allocation5], %s1242_s8 }
  0x23   : > { %v1005_v14 = vpack.c.bf16 (!%p230_p12), %v1259_v13, %v1255_v11  ;;  %v1009_v17 = vpack.c.bf16 (!%p230_p12), %v1265_v16, %v1263_v15  ;;  %v1269_v18 = vld [vmem:[%s238_s12 + $0x30] sm:$0xff] (!%p230_p12)  ;;  %v1271_v19 = vld [vmem:[%s238_s12 + $0x38] sm:$0xff] (!%p230_p12)  ;;  %v282_v29 = vld [vmem:[%s1471_s0 + $0x48] sm:$0xff] (!%p230_p12) }
  0x24   : > { %1002 = vmatprep.subr.bf16.mxu0 (!%p230_p12), %v1001_v12  ;;  %v1013_v20 = vpack.c.bf16 (!%p230_p12), %v1271_v19, %v1269_v18  ;;  %v283_v30 = vld [vmem:[%s1471_s0 + $0x50] sm:$0xff] (!%p230_p12)  ;;  %v284_v31 = vld [vmem:[%s1471_s0 + $0x58] sm:$0xff] (!%p230_p12)  ;;  %v285_v32 = vld [vmem:[%s1471_s0 + $0x60] sm:$0xff] (!%p230_p12) }
  0x25   : > { %1004 = vmatpush3.bf16.msra.mxu0 (!%p230_p12), %v1001_v12  ;;  %v286_v33 = vld [vmem:[%s1471_s0 + $0x68] sm:$0xff] (!%p230_p12)  ;;  %v287_v34 = vld [vmem:[%s1471_s0 + $0x70] sm:$0xff] (!%p230_p12)  ;;  %v288_v35 = vld [vmem:[%s1471_s0 + $0x78] sm:$0xff] (!%p230_p12) }
  0x26   : > { %1006 = vmatprep.subr.bf16.mxu0 %v1005_v14  ;;  %v499_v36 = vld [vmem:[%s1472_s1] sm:$0xff]  ;;  %v500_v61 = vld [vmem:[%s1472_s1 + $0x8] sm:$0xff]  ;;  %v501_v62 = vld [vmem:[%s1472_s1 + $0x10] sm:$0xff]  ;;  %s865_s27 = sshll.u32 (%p1223_p6), %s1205_s19, 3 }
  0x27   : > { %989 = vmatprep.mubr.f32.mxu1 %v499_v36  ;;  %v502_v63 = vld [vmem:[%s1472_s1 + $0x18] sm:$0xff]  ;;  %v503_v0 = vld [vmem:[%s1472_s1 + $0x20] sm:$0xff]  ;;  %v504_v1 = vld [vmem:[%s1472_s1 + $0x28] sm:$0xff]  ;;  %s641_s30 = scalar_lea.vmem (%p1223_p6), %s1474_s3, %s865_s27 }
  0x28   : > { %v505_v2 = vld [vmem:[%s1472_s1 + $0x30] sm:$0xff]  ;;  %v506_v3 = vld [vmem:[%s1472_s1 + $0x38] sm:$0xff] }
  0x29   : > { %1008 = vmatpush3.bf16.msra.mxu0 %v1005_v14 }
  0x2a   : > { %1010 = vmatprep.subr.bf16.mxu0 %v1009_v17 }
  0x2d   : > { %1012 = vmatpush3.bf16.msra.mxu0 %v1009_v17 }
  0x2e   : > { %1014 = vmatprep.subr.bf16.mxu0 %v1013_v20 }
  0x31   : > { %1016 = vmatpush3.bf16.msra.mxu0 %v1013_v20 }
  0x34   : > { %934 = vmatmul.mubr.msk.f32.vlgmr.msra.gmra.mrb[0].mxu0 %vm289_vm0, %v274_v21 }
  0x35   : > { %936 = vmatprep.mubr.msk.f32.mxu0 %vm289_vm0, %v275_v22 }
  0x38   : > { %937 = vmatmul.mubr.msk.f32.gmra.mrb[2].mxu0 %vm289_vm0, %v276_v23 }
  0x39   : > { %939 = vmatprep.mubr.msk.f32.mxu0 %vm289_vm0, %v277_v24 }
  0x3c   : > { %940 = vmatmul.mubr.msk.f32.gmra.mrb[4].mxu0 %vm289_vm0, %v278_v25 }
  0x3d   : > { %942 = vmatprep.mubr.msk.f32.mxu0 %vm289_vm0, %v279_v26 }
  0x40   : > { %943 = vmatmul.mubr.msk.f32.gmra.mrb[6].mxu0 %vm289_vm0, %v280_v27 }
  0x41   : > { %945 = vmatprep.mubr.msk.f32.mxu0 %vm289_vm0, %v281_v28 }
  0x44   : > { %946 = vmatmul.mubr.msk.f32.gmra.mrb[8].mxu0 %vm289_vm0, %v282_v29 }
  0x45   : > { %948 = vmatprep.mubr.msk.f32.mxu0 %vm289_vm0, %v283_v30 }
  0x48   : > { %949 = vmatmul.mubr.msk.f32.gmra.mrb[10].mxu0 %vm289_vm0, %v284_v31 }
  0x49   : > { %951 = vmatprep.mubr.msk.f32.mxu0 %vm289_vm0, %v285_v32 }
  0x4c   : > { %952 = vmatmul.mubr.msk.f32.gmra.mrb[12].mxu0 %vm289_vm0, %v286_v33 }
  0x4d   : > { %954 = vmatprep.mubr.msk.f32.mxu0 %vm289_vm0, %v287_v34 }
  0x50   : > { %955 = vmatmul.mubr.msk.f32.gmra.mrb[14].mxu0 %vm289_vm0, %v288_v35 }
 0x107   : > { %v935_v37 = vpop.f32.mrb[0].mxu0 }
 0x108   : > { %484 = vst [vmem:[%s1339_s22 + $0x8] sm:$0xff] %v935_v37  ;;  %v404_v38 = vpop.f32.mrb[1].mxu0 }
 0x109   : > { %483 = vst [vmem:[%s1339_s22] sm:$0xff] %v404_v38  ;;  %v1017_v39 = vpack.c.bf16 %v935_v37, %v404_v38 }
 0x10b   : > { %v938_v40 = vpop.f32.mrb[2].mxu0  ;;  %1018 = vmatprep.subr.bf16.mxu1 %v1017_v39 }
 0x10c   : > { %486 = vst [vmem:[%s1339_s22 + $0x18] sm:$0xff] %v938_v40  ;;  %v414_v41 = vpop.f32.mrb[3].mxu0  ;;  %1020 = vmatpush3.bf16.msra.mxu1 %v1017_v39 }
 0x10d   : > { %485 = vst [vmem:[%s1339_s22 + $0x10] sm:$0xff] %v414_v41  ;;  %v1021_v42 = vpack.c.bf16 %v938_v40, %v414_v41 }
 0x10f   : > { %v941_v43 = vpop.f32.mrb[4].mxu0  ;;  %1022 = vmatprep.subr.bf16.mxu1 %v1021_v42 }
 0x110   : > { %488 = vst [vmem:[%s1339_s22 + $0x28] sm:$0xff] %v941_v43  ;;  %v424_v44 = vpop.f32.mrb[5].mxu0  ;;  %1024 = vmatpush3.bf16.msra.mxu1 %v1021_v42 }
 0x111   : > { %487 = vst [vmem:[%s1339_s22 + $0x20] sm:$0xff] %v424_v44  ;;  %v1025_v45 = vpack.c.bf16 %v941_v43, %v424_v44 }
 0x113   : > { %v944_v46 = vpop.f32.mrb[6].mxu0  ;;  %1026 = vmatprep.subr.bf16.mxu1 %v1025_v45 }
 0x114   : > { %490 = vst [vmem:[%s1339_s22 + $0x38] sm:$0xff] %v944_v46  ;;  %v434_v47 = vpop.f32.mrb[7].mxu0  ;;  %1028 = vmatpush3.bf16.msra.mxu1 %v1025_v45 }
 0x115   : > { %489 = vst [vmem:[%s1339_s22 + $0x30] sm:$0xff] %v434_v47  ;;  %v1029_v48 = vpack.c.bf16 %v944_v46, %v434_v47 }
 0x117   : > { %v947_v49 = vpop.f32.mrb[8].mxu0  ;;  %1030 = vmatprep.subr.bf16.mxu1 %v1029_v48  ;;  %v709_v25 = vld [vmem:[%s1339_s22 + $0x28] sm:$0xff] (%p1223_p6) }
 0x118   : > { %492 = vst [vmem:[%s1339_s22 + $0x48] sm:$0xff] %v947_v49  ;;  %v444_v50 = vpop.f32.mrb[9].mxu0  ;;  %1032 = vmatpush3.bf16.msra.mxu1 %v1029_v48  ;;  %710 = vst [vmem:[%s641_s30 + $0x50] sm:$0xff] (%p1223_p6), %v709_v25 }
 0x119   : > { %491 = vst [vmem:[%s1339_s22 + $0x40] sm:$0xff] %v444_v50  ;;  %v1033_v51 = vpack.c.bf16 %v947_v49, %v444_v50 }
 0x11b   : > { %v950_v52 = vpop.f32.mrb[10].mxu0  ;;  %1034 = vmatprep.subr.bf16.mxu1 %v1033_v51  ;;  %v713_v27 = vld [vmem:[%s1339_s22 + $0x38] sm:$0xff] (%p1223_p6) }
 0x11c   : > { %494 = vst [vmem:[%s1339_s22 + $0x58] sm:$0xff] %v950_v52  ;;  %v454_v53 = vpop.f32.mrb[11].mxu0  ;;  %1036 = vmatpush3.bf16.msra.mxu1 %v1033_v51  ;;  %v711_v26 = vld [vmem:[%s1339_s22 + $0x30] sm:$0xff] (%p1223_p6)  ;;  %714 = vst [vmem:[%s641_s30 + $0x70] sm:$0xff] (%p1223_p6), %v713_v27 }
 0x11d   : > { %493 = vst [vmem:[%s1339_s22 + $0x50] sm:$0xff] %v454_v53  ;;  %v1037_v54 = vpack.c.bf16 %v950_v52, %v454_v53  ;;  %712 = vst [vmem:[%s641_s30 + $0x60] sm:$0xff] (%p1223_p6), %v711_v26 }
 0x11f   : > { %v953_v55 = vpop.f32.mrb[12].mxu0  ;;  %1038 = vmatprep.subr.bf16.mxu1 %v1037_v54  ;;  %v717_v29 = vld [vmem:[%s1339_s22 + $0x48] sm:$0xff] (%p1223_p6) }
 0x120   : > { %496 = vst [vmem:[%s1339_s22 + $0x68] sm:$0xff] %v953_v55  ;;  %v464_v56 = vpop.f32.mrb[13].mxu0  ;;  %1040 = vmatpush3.bf16.msra.mxu1 %v1037_v54  ;;  %v715_v28 = vld [vmem:[%s1339_s22 + $0x40] sm:$0xff] (%p1223_p6)  ;;  %718 = vst [vmem:[%s641_s30 + $0x90] sm:$0xff] (%p1223_p6), %v717_v29 }
 0x121   : > { %495 = vst [vmem:[%s1339_s22 + $0x60] sm:$0xff] %v464_v56  ;;  %v1041_v57 = vpack.c.bf16 %v953_v55, %v464_v56  ;;  %716 = vst [vmem:[%s641_s30 + $0x80] sm:$0xff] (%p1223_p6), %v715_v28 }
 0x123   : > { %v956_v58 = vpop.f32.mrb[14].mxu0  ;;  %1042 = vmatprep.subr.bf16.mxu1 %v1041_v57  ;;  %v721_v31 = vld [vmem:[%s1339_s22 + $0x58] sm:$0xff] (%p1223_p6) }
 0x124   : > { %498 = vst [vmem:[%s1339_s22 + $0x78] sm:$0xff] %v956_v58  ;;  %v474_v59 = vpop.f32.mrb[15].mxu0  ;;  %1044 = vmatpush3.bf16.msra.mxu1 %v1041_v57  ;;  %v719_v30 = vld [vmem:[%s1339_s22 + $0x50] sm:$0xff] (%p1223_p6)  ;;  %722 = vst [vmem:[%s641_s30 + $0xb0] sm:$0xff] (%p1223_p6), %v721_v31 }
 0x125   : > { %497 = vst [vmem:[%s1339_s22 + $0x70] sm:$0xff] %v474_v59  ;;  %v1045_v60 = vpack.c.bf16 %v956_v58, %v474_v59  ;;  %720 = vst [vmem:[%s641_s30 + $0xa0] sm:$0xff] (%p1223_p6), %v719_v30 }
 0x127   : > { %1046 = vmatprep.subr.bf16.mxu1 %v1045_v60  ;;  %v725_v33 = vld [vmem:[%s1339_s22 + $0x68] sm:$0xff] (%p1223_p6) }
 0x128   : > { %1048 = vmatpush3.bf16.msra.mxu1 %v1045_v60  ;;  %v723_v32 = vld [vmem:[%s1339_s22 + $0x60] sm:$0xff] (%p1223_p6)  ;;  %726 = vst [vmem:[%s641_s30 + $0xd0] sm:$0xff] (%p1223_p6), %v725_v33 }
 0x129   : > { %724 = vst [vmem:[%s641_s30 + $0xc0] sm:$0xff] (%p1223_p6), %v723_v32 }
 0x12b   : > { %990 = vmatmul.mubr.f32.vlgmr.msra.gmra.mrb[0].mxu1 %v500_v61  ;;  %v729_v35 = vld [vmem:[%s1339_s22 + $0x78] sm:$0xff] (%p1223_p6) }
 0x12c   : > { %992 = vmatprep.mubr.f32.mxu1 %v501_v62  ;;  %v727_v34 = vld [vmem:[%s1339_s22 + $0x70] sm:$0xff] (%p1223_p6)  ;;  %730 = vst [vmem:[%s641_s30 + $0xf0] sm:$0xff] (%p1223_p6), %v729_v35 }
 0x12d   : > { %728 = vst [vmem:[%s641_s30 + $0xe0] sm:$0xff] (%p1223_p6), %v727_v34 }
 0x12f   : > { %993 = vmatmul.mubr.f32.gmra.mrb[2].mxu1 %v502_v63 }
 0x130   : > { %995 = vmatprep.mubr.f32.mxu1 %v503_v0 }
 0x133   : > { %996 = vmatmul.mubr.f32.gmra.mrb[4].mxu1 %v504_v1 }
 0x134   : > { %998 = vmatprep.mubr.f32.mxu1 %v505_v2 }
 0x137   : > { %999 = vmatmul.mubr.f32.gmra.mrb[6].mxu1 %v506_v3 }
 0x1fe   : > { %v991_v4 = vpop.f32.mrb[0].mxu1 }
 0x1ff   : > { %v613_v5 = vsub.f32 %v1253_v10, %v991_v4  ;;  %v573_v6 = vpop.f32.mrb[1].mxu1 }
 0x200   : > { %v612_v7 = vsub.f32 %v1251_v9, %v573_v6 }
 0x201   : > { %621 = vst [vmem:[%s1382_s23 + $0x8] sm:$0xff] %v613_v5 }
 0x202   : > { %620 = vst [vmem:[%s1382_s23] sm:$0xff] %v612_v7  ;;  %v994_v8 = vpop.f32.mrb[2].mxu1 }
 0x203   : > { %v615_v12 = vsub.f32 %v1259_v13, %v994_v8  ;;  %v583_v10 = vpop.f32.mrb[3].mxu1 }
 0x204   : > { %v614_v9 = vsub.f32 %v1255_v11, %v583_v10  ;;  %v699_v11 = vld [vmem:[%s1339_s22] sm:$0xff] (%p1223_p6) }
 0x205   : > { %623 = vst [vmem:[%s1382_s23 + $0x18] sm:$0xff] %v615_v12  ;;  %700 = vst [vmem:[%s641_s30] sm:$0xff] (%p1223_p6), %v699_v11 }
 0x206   : > { %622 = vst [vmem:[%s1382_s23 + $0x10] sm:$0xff] %v614_v9  ;;  %v997_v14 = vpop.f32.mrb[4].mxu1 }
 0x207   : > { %v617_v17 = vsub.f32 %v1265_v16, %v997_v14  ;;  %v593_v20 = vpop.f32.mrb[5].mxu1  ;;  %v703_v16 = vld [vmem:[%s1339_s22 + $0x10] sm:$0xff] (%p1223_p6) }
 0x208   : > { %v616_v21 = vsub.f32 %v1263_v15, %v593_v20  ;;  %639 = sbr.rel (!%p1223_p6) target bundleno = 527 (0x20f), region = 74  ;;  %v701_v15 = vld [vmem:[%s1339_s22 + $0x8] sm:$0xff] (%p1223_p6)  ;;  %704 = vst [vmem:[%s641_s30 + $0x20] sm:$0xff] (%p1223_p6), %v703_v16 }
 0x209   : > { %625 = vst [vmem:[%s1382_s23 + $0x28] sm:$0xff] %v617_v17  ;;  %702 = vst [vmem:[%s641_s30 + $0x10] sm:$0xff] (%p1223_p6), %v701_v15 }
 0x20a   : > { %624 = vst [vmem:[%s1382_s23 + $0x20] sm:$0xff] %v616_v21  ;;  %v1000_v22 = vpop.f32.mrb[6].mxu1 }
 0x20b   : > { %v619_v23 = vsub.f32 %v1271_v19, %v1000_v22  ;;  %v603_v24 = vpop.f32.mrb[7].mxu1  ;;  %v707_v19 = vld [vmem:[%s1339_s22 + $0x20] sm:$0xff] (%p1223_p6) }
 0x20c   : > { %v618_v13 = vsub.f32 %v1269_v18, %v603_v24  ;;  %v705_v18 = vld [vmem:[%s1339_s22 + $0x18] sm:$0xff] (%p1223_p6)  ;;  %708 = vst [vmem:[%s641_s30 + $0x40] sm:$0xff] (%p1223_p6), %v707_v19 }
 0x20d   : > { %627 = vst [vmem:[%s1382_s23 + $0x38] sm:$0xff] %v619_v23  ;;  %706 = vst [vmem:[%s641_s30 + $0x30] sm:$0xff] (%p1223_p6), %v705_v18 }
 0x20e   : > { %626 = vst [vmem:[%s1382_s23 + $0x30] sm:$0xff] %v618_v13 }
 0x20f PF: > { %s866_s5 = sshll.u32 %s1205_s19, 7  ;;  %s742_s6 = sshll.u32 %s1382_s23, 4  ;;  %s1428_s6 = int_to_ptr.vmem [resolvable:$true] %s742_s6 }
 0x210   : > { %s1426_s10 = scalar_lea.hbm %s1475_s4, %s866_s5  ;;  %s1091_s12 = scalar_lea.vmem %s1428_s6, 1024 }
 0x211   : > { %p1092_p13 = scmp.ne.s32.totalorder %s1428_s6, %s1091_s12  ;;  %s1155_s22 = smov [#allocation4]  }
 0x212   : > { %s1095_s13 = sshll.u32 %s1155_s22, 4  ;;  %s1096_s13 = int_to_ptr.vmem [resolvable:$false] %s1095_s13 }
 0x213   : > { %p1093_p0 = pnand %p1092_p13, %p1223_p6  ;;  %s1097_s19 = scalar_lea.vmem %s1096_s13, 2048 }
 0x214   : > { %p1098_p2 = scmp.lt.s32.totalorder %s1428_s6, %s1096_s13  ;;  %p1099_p3 = scmp.lt.s32.totalorder %s1097_s19, %s1091_s12 }
 0x215   : > { %p1094_p1 = pneg %p1093_p0 }
 0x216   : > { %p1100_p4 = por %p1099_p3, %p1098_p2 }
 0x218   : > { %p1101_p5 = pnand %p1100_p4, %p1094_p1 }
 0x21a   : > { %1104 = shalt.err (!%p1101_p5)
}
 0x21b   : > { %s1105_s14 = scalar_lea.hbm %s1426_s10, 1024  ;;  %s1109_s27 = scalar_lea.hbm %s1475_s4, 2048 }
 0x21c   : > { %p1106_p7 = scmp.ne.s32.totalorder %s1426_s10, %s1105_s14  ;;  %p1110_p12 = scmp.lt.u32.totalorder %s1426_s10, %s1475_s4 }
 0x21d   : > { %p1111_p13 = scmp.lt.u32.totalorder %s1109_s27, %s1105_s14  ;;  %p1113_p1 = scmp.lt.u32.totalorder %s1105_s14, %s1426_s10 }
 0x21e   : > { %p1107_p10 = pnand %p1106_p7, %p1223_p6 }
 0x21f   : > { %p1112_p0 = por %p1111_p13, %p1110_p12 }
 0x220   : > { %p1108_p11 = pneg %p1107_p10 }
 0x221   : > { %p1114_p2 = por %p1113_p1, %p1112_p0 }
 0x223   : > { %p1115_p3 = pnand %p1114_p2, %p1108_p11 }
 0x225   : > { %1118 = shalt.err (!%p1115_p3)
}
 0x226   : > { %s1156_s30 = smov 128   ;;  %s1157_s5 = smov 256  }
 0x227   : > { %s1158_s7 = smov 8  }
 0x228   : > { %1049 = dma.vmem_to_hbm [thread:$0]  (%p1223_p6), %s1428_s6, 1024, %s1426_s10, %s633_s11, %s1156_s30, %s1157_s5, %s1158_s7  }
 0x229 PF: > { %s764_s9 = sand.u32 1, %s1141_s15   ;;  %p1052_p4 = pnand %p840_p9, %p1227_p8 }
 0x22a   : > { %s765_s12 = scalar_lea.sflag [#allocation5], %s764_s9 }
 0x22b   : > { %1136 = dma.done.wait (!%p1052_p4), %s765_s12, 1024  }
 0x22c   : > { %1138 = vsyncadd (!%p1052_p4), %s765_s12, 4294966272  ;;  %p15_p5 = scmp.ge.s32.totalorder %s1209_s21, 4   ;;  %s1478_s15 = smov %s1145_s16 }
 0x22d   : > { %s1479_s16 = smov %s1149_s17  ;;  %s1480_s17 = smov %s1221_s24 }
 0x22e   : > { %s1481_s18 = smov %s1209_s21  ;;  %17 = sbr.rel (!%p15_p5) target bundleno = 3 (0x3), region = 160 }
 0x235   :  { %770 = vsyncpa [#allocation5], 1 }
 0x236   :  { %772 = vsyncpa [#allocation5 + $0x1], 1 }

</bundles_post_ra>
